<compile_context>
chip_gen: v6e
topology: v6e:2x2x1
jax: 0.10.0
libtpu: 0.0.40
codegen_flags: <defaults>
</compile_context>

<pallas_src>
import functools
import math

import jax
import jax.numpy as jnp
from jax.experimental import pallas as pl
from jax.experimental.pallas import tpu as pltpu


def arc_margin_kernel(x_ref, w_ref, label_ref, out_ref, *,
                      s, cos_m, sin_m, th_s, mm_s, easy_margin):
    # x_ref:     (TILE_B, D)  bf16, rows already normalized and pre-scaled by s
    # w_ref:     (D, TILE_C)  bf16, columns (classes) already normalized
    # label_ref: (TILE_B, 1)  int32
    # out_ref:   (TILE_B, TILE_C)
    c_s = jax.lax.dot_general(                       # c_s = s * cosine, f32 accumulation
        x_ref[...], w_ref[...],
        dimension_numbers=(((1,), (0,)), ((), ())),
        preferred_element_type=jnp.float32)

    # Margin math in the scaled domain (all f32 VPU/EUP; sqrt arg clamped at 0 so bf16/fp
    # rounding that pushes |cosine| marginally past 1 stays real).
    sine_s = jnp.sqrt(jnp.maximum(s * s - c_s * c_s, 0.0))     # s * sine
    phi_s = c_s * cos_m - sine_s * sin_m                       # s * phi
    if easy_margin:
        phi_s = jnp.where(c_s > 0.0, phi_s, c_s)
    else:
        phi_s = jnp.where(c_s > th_s, phi_s, c_s - mm_s)

    # one-hot scatter as a broadcast iota-compare: (1, TILE_C) ids vs (TILE_B, 1) labels.
    tc = out_ref.shape[1]
    col_ids = (jax.lax.broadcasted_iota(jnp.int32, (1, tc), 1)
               + pl.program_id(0) * tc)              # grid axis 0 tiles out_features
    mask = col_ids == label_ref[...]
    out_ref[...] = jnp.where(mask, phi_s, c_s).astype(out_ref.dtype)


def _round_up(v, mult):
    return (v + mult - 1) // mult * mult


def _balanced_tile(n, max_tile, granule):
    """Tile size <= max_tile, multiple of `granule`, with padding bounded by one granule."""
    n_g = _round_up(n, granule)
    max_tile = max(granule, _round_up(max_tile, granule))
    num = -(-n_g // max_tile)                        # ceil
    tile = _round_up(-(-n_g // num), granule)
    return tile, tile * num


def arc_margin_product(x, weight, label, *, s=32.0, m=0.5, easy_margin=False,
                       tile_b=512, tile_c=2048, out_dtype=jnp.float32):
    """x: (B, in_features) f32, weight: (out_features, in_features) f32, label: (B,) int.
    Returns (B, out_features) `out_dtype` (default f32, matching the PyTorch module)."""
    B, D = x.shape
    C, D2 = weight.shape
    assert D == D2

    # Balanced tiles: bf16 x rows pack 16/sublane-tile; classes lane-granular (256 for the
    # 256-wide MXU when C is large enough that the extra padding is negligible).
    TILE_B, B_pad = _balanced_tile(B, tile_b, 16)
    granule_c = 256 if _round_up(C, 128) >= 2048 else 128
    TILE_C, C_pad = _balanced_tile(C, tile_c, granule_c)

    # Hoisted normalizations (f32).  s is folded into x so the matmul yields s*cosine
    # directly; the guard keeps zero rows (and any padding) finite.
    x32 = x.astype(jnp.float32)
    x_sn = (x32 * (float(s) * jax.lax.rsqrt(
        jnp.maximum(jnp.sum(x32 * x32, axis=1, keepdims=True), 1e-24)))
            ).astype(jnp.bfloat16)                                   # (B, D)
    w32 = weight.astype(jnp.float32)
    w_n = (w32 * jax.lax.rsqrt(
        jnp.maximum(jnp.sum(w32 * w32, axis=1, keepdims=True), 1e-24))
           ).astype(jnp.bfloat16)
    w_nt = w_n.T                                                     # (D, C), K-major NN feed

    if B_pad != B:
        x_sn = jnp.pad(x_sn, ((0, B_pad - B), (0, 0)))
    if C_pad != C:
        w_nt = jnp.pad(w_nt, ((0, 0), (0, C_pad - C)))
    label2d = label.astype(jnp.int32).reshape(B, 1)
    if B_pad != B:
        label2d = jnp.pad(label2d, ((0, B_pad - B), (0, 0)))

    grid = (C_pad // TILE_C, B_pad // TILE_B)   # C outer: weight tile held across inner B axis

    kernel = functools.partial(
        arc_margin_kernel,
        s=float(s),
        cos_m=math.cos(m),
        sin_m=math.sin(m),
        th_s=float(s) * math.cos(math.pi - m),
        mm_s=float(s) * math.sin(math.pi - m) * m,
        easy_margin=bool(easy_margin),
    )

    # VMEM budget: double-buffered blocks + f32 epilogue temporaries, capped with headroom
    # under v7x's 64 MiB physical VMEM per TensorCore.
    out_bytes = jnp.dtype(out_dtype).itemsize
    blk_bytes = (2 * TILE_B * D * 2                    # x tile, bf16
                 + 2 * D * TILE_C * 2                  # weight tile, bf16
                 + 2 * TILE_B * 128 * 4                # label tile (lane-padded), int32
                 + 2 * TILE_B * TILE_C * out_bytes     # output tile
                 + 4 * TILE_B * TILE_C * 4)            # f32 epilogue temps (c_s/sine/phi/mask)
    vmem_limit = int(min(48 * 1024 * 1024,
                         max(16 * 1024 * 1024, blk_bytes + (4 << 20))))

    out = pl.pallas_call(
        kernel,
        out_shape=jax.ShapeDtypeStruct((B_pad, C_pad), out_dtype),
        grid=grid,
        in_specs=[
            pl.BlockSpec((TILE_B, D), lambda cj, bi: (bi, 0)),       # x (re-used across cj)
            pl.BlockSpec((D, TILE_C), lambda cj, bi: (0, cj)),       # weight (held over bi)
            pl.BlockSpec((TILE_B, 1), lambda cj, bi: (bi, 0)),       # label
        ],
        out_specs=pl.BlockSpec((TILE_B, TILE_C), lambda cj, bi: (bi, cj)),
        compiler_params=pltpu.CompilerParams(
            # Only the C axis is megacore-shardable so each TC streams each weight byte once.
            dimension_semantics=("parallel", "arbitrary"),
            vmem_limit_bytes=vmem_limit),
    )(x_sn, w_nt, label2d)

    return out[:B, :C]


def arc_margin_product_ref(x, weight, label, *, s=32.0, m=0.5, easy_margin=False):
    """Pure-JAX f32 reference mirroring the PyTorch forward."""
    cos_m, sin_m = math.cos(m), math.sin(m)
    th, mm = math.cos(math.pi - m), math.sin(math.pi - m) * m
    xn = x / jnp.maximum(jnp.linalg.norm(x, axis=1, keepdims=True), 1e-12)
    wn = weight / jnp.maximum(jnp.linalg.norm(weight, axis=1, keepdims=True), 1e-12)
    cosine = xn @ wn.T
    sine = jnp.sqrt(1.0 - cosine ** 2)
    phi = cosine * cos_m - sine * sin_m
    if easy_margin:
        phi = jnp.where(cosine > 0, phi, cosine)
    else:
        phi = jnp.where(cosine - th > 0, phi, cosine - mm)
    one_hot = jax.nn.one_hot(label, cosine.shape[1], dtype=cosine.dtype)
    return (one_hot * phi + (1.0 - one_hot) * cosine) * s


if __name__ == "__main__":
    # Module defaults: in_features=128, out_features=200, s=32.0, m=0.5
    B, IN_FEATURES, OUT_FEATURES = 8, 128, 200

    key = jax.random.PRNGKey(0)
    kx, kw, kl = jax.random.split(key, 3)

    x = jax.random.normal(kx, (B, IN_FEATURES), dtype=jnp.float32)
    label = jax.random.randint(kl, (B,), 0, OUT_FEATURES, dtype=jnp.int32)

    # Deterministic xavier_uniform_ init: U(-a, a), a = sqrt(6/(fan_in+fan_out))
    bound = math.sqrt(6.0 / (IN_FEATURES + OUT_FEATURES))
    weight = jax.random.uniform(
        kw, (OUT_FEATURES, IN_FEATURES), dtype=jnp.float32,
        minval=-bound, maxval=bound)

    out = jax.block_until_ready(
        arc_margin_product(x, weight, label, s=32.0, m=0.5, easy_margin=False))
    ref = arc_margin_product_ref(x, weight, label, s=32.0, m=0.5, easy_margin=False)
    assert out.shape == (B, OUT_FEATURES)
    # bf16 MXU operands shift cosine by ~1e-3; tolerance sized accordingly (output is *s).
    assert jnp.allclose(out, ref, rtol=2e-2, atol=1e-1), "mismatch vs reference (hard margin)"

    # Second config: easy_margin branch, no padding needed (C=384 multiple of 128).  Label
    # column cosines are pushed far from the easy_margin threshold (0) so bf16 rounding
    # cannot flip the branch vs the f32 reference.
    B2, C2 = 16, 384
    kx2, kw2, kl2 = jax.random.split(jax.random.PRNGKey(1), 3)
    w2 = jax.random.normal(kw2, (C2, IN_FEATURES), dtype=jnp.float32) * 0.05
    l2 = jax.random.randint(kl2, (B2,), 0, C2, dtype=jnp.int32)
    x2 = w2[l2] + 0.02 * jax.random.normal(kx2, (B2, IN_FEATURES), dtype=jnp.float32)

    out2 = jax.block_until_ready(
        arc_margin_product(x2, w2, l2, s=30.0, m=0.35, easy_margin=True))
    ref2 = arc_margin_product_ref(x2, w2, l2, s=30.0, m=0.35, easy_margin=True)
    assert out2.shape == (B2, C2)
    assert jnp.allclose(out2, ref2, rtol=2e-2, atol=1e-1), "mismatch vs reference (easy margin)"

    # Third run: force multiple C tiles (exercises the per-tile class-id offset path).
    out3 = jax.block_until_ready(
        arc_margin_product(x2, w2, l2, s=30.0, m=0.35, easy_margin=True,
                           tile_b=16, tile_c=128))
    assert jnp.allclose(out3, ref2, rtol=2e-2, atol=1e-1), "mismatch vs reference (multi-tile)"

    print("KERNEL_OK")
</pallas_src>

<mosaic_0001>
module attributes {stable_mosaic.version = 11 : i64} {
  func.func @arc_margin_kernel(%arg0: i32, %arg1: i32, %arg2: memref<16x128xbf16, #tpu.memory_space<vmem>>, %arg3: memref<128x256xbf16, #tpu.memory_space<vmem>>, %arg4: memref<16x1xi32, #tpu.memory_space<vmem>>, %arg5: memref<16x256xf32, #tpu.memory_space<vmem>>) attributes {dimension_semantics = [#tpu.dimension_semantics<parallel>, #tpu.dimension_semantics<arbitrary>], iteration_bounds = array<i64: 1, 1>, scalar_prefetch = 0 : i64, scratch_operands = 0 : i64, tpu.core_type = #tpu.core_type<tc>, window_params = [{transform_indices = @transform_0, window_bounds = array<i64: 16, 128>}, {transform_indices = @transform_1, window_bounds = array<i64: 128, 256>}, {transform_indices = @transform_2, window_bounds = array<i64: 16, 1>}, {transform_indices = @transform_3, window_bounds = array<i64: 16, 256>}]} {
    %c0 = arith.constant 0 : index
    %c0_0 = arith.constant 0 : index
    %0 = vector.load %arg2[%c0, %c0_0] : memref<16x128xbf16, #tpu.memory_space<vmem>>, vector<16x128xbf16>
    %c0_1 = arith.constant 0 : index
    %c0_2 = arith.constant 0 : index
    %1 = vector.load %arg3[%c0_1, %c0_2] : memref<128x256xbf16, #tpu.memory_space<vmem>>, vector<128x256xbf16>
    %cst = arith.constant dense<0.000000e+00> : vector<16x256xf32>
    %2 = tpu.matmul %0, %1, %cst {dimension_numbers = #tpu.dot_dimension_numbers<[1], [0], [0], [1], [0, 0, 1, 1], [], []>} : vector<16x128xbf16>, vector<128x256xbf16>, vector<16x256xf32> -> vector<16x256xf32>
    %3 = arith.mulf %2, %2 : vector<16x256xf32>
    %cst_3 = arith.constant 1.024000e+03 : f32
    %4 = vector.broadcast %cst_3 : f32 to vector<16x256xf32>
    %5 = arith.subf %4, %3 : vector<16x256xf32>
    %cst_4 = arith.constant 0.000000e+00 : f32
    %6 = vector.broadcast %cst_4 : f32 to vector<16x256xf32>
    %7 = arith.maximumf %5, %6 : vector<16x256xf32>
    %8 = math.sqrt %7 : vector<16x256xf32>
    %cst_5 = arith.constant 0.87758255 : f32
    %9 = vector.broadcast %cst_5 : f32 to vector<16x256xf32>
    %10 = arith.mulf %2, %9 : vector<16x256xf32>
    %cst_6 = arith.constant 0.47942555 : f32
    %11 = vector.broadcast %cst_6 : f32 to vector<16x256xf32>
    %12 = arith.mulf %8, %11 : vector<16x256xf32>
    %13 = arith.subf %10, %12 : vector<16x256xf32>
    %cst_7 = arith.constant -28.0826416 : f32
    %14 = vector.broadcast %cst_7 : f32 to vector<16x256xf32>
    %15 = arith.cmpf ogt, %2, %14 : vector<16x256xf32>
    %cst_8 = arith.constant 7.67080879 : f32
    %16 = vector.broadcast %cst_8 : f32 to vector<16x256xf32>
    %17 = arith.subf %2, %16 : vector<16x256xf32>
    %18 = arith.select %15, %13, %17 : vector<16x256xi1>, vector<16x256xf32>
    %19 = tpu.iota {dimensions = array<i32: 1>} : vector<1x256xi32>
    %c256_i32 = arith.constant 256 : i32
    %20 = arith.muli %arg0, %c256_i32 : i32
    %21 = vector.broadcast %20 : i32 to vector<1x256xi32>
    %22 = arith.addi %19, %21 : vector<1x256xi32>
    %c0_9 = arith.constant 0 : index
    %c0_10 = arith.constant 0 : index
    %23 = vector.load %arg4[%c0_9, %c0_10] : memref<16x1xi32, #tpu.memory_space<vmem>>, vector<16x1xi32>
    %24 = vector.broadcast %22 : vector<1x256xi32> to vector<16x256xi32>
    %25 = vector.broadcast %23 : vector<16x1xi32> to vector<16x256xi32>
    %26 = arith.cmpi eq, %24, %25 : vector<16x256xi32>
    %27 = arith.select %26, %18, %2 : vector<16x256xi1>, vector<16x256xf32>
    %c0_11 = arith.constant 0 : index
    %c0_12 = arith.constant 0 : index
    %28 = vector.load %arg5[%c0_11, %c0_12] : memref<16x256xf32, #tpu.memory_space<vmem>>, vector<16x256xf32>
    tpu.vector_store %arg5[%c0_11, %c0_12], %27 {strides = array<i32>} : memref<16x256xf32, #tpu.memory_space<vmem>>, vector<16x256xf32>,
    return
  }
  func.func @transform_0(%arg0: i32, %arg1: i32) -> (i32, i32) {
    %c0_i32 = arith.constant 0 : i32
    %c0_i32_0 = arith.constant 0 : i32
    return %arg1, %c0_i32 : i32, i32
  }
  func.func @transform_1(%arg0: i32, %arg1: i32) -> (i32, i32) {
    %c0_i32 = arith.constant 0 : i32
    %c0_i32_0 = arith.constant 0 : i32
    return %c0_i32, %arg0 : i32, i32
  }
  func.func @transform_2(%arg0: i32, %arg1: i32) -> (i32, i32) {
    %c0_i32 = arith.constant 0 : i32
    %c0_i32_0 = arith.constant 0 : i32
    return %arg1, %c0_i32 : i32, i32
  }
  func.func @transform_3(%arg0: i32, %arg1: i32) -> (i32, i32) {
    %c0_i32 = arith.constant 0 : i32
    return %arg1, %arg0 : i32, i32
  }
}

</mosaic_0001>

<bundles_post_ra>
// kernel: tpu_custom_call.1
= control target key start
LH: loop header
LB: loop body
LE: loop exit
PB: predicated region body
PF: predicated region fallthrough
CT: control target
= control target key end

     0   :  { %8 = vsyncpa [#allocation3], 0  ;;  %s473_s0 = inlined_call_operand.vmem [shape: bf16[16,128], index: 0, kind: input, shape index: {}]   ;;  %s474_s1 = inlined_call_operand.hbm [shape: bf16[128,256], index: 1, kind: input, shape index: {}]   ;;  %s475_s2 = inlined_call_operand.vmem [shape: s32[16,1], index: 2, kind: input, shape index: {}]   ;;  %s476_s3 = inlined_call_operand.hbm [shape: f32[16,256], index: 3, kind: output, shape index: {}]  }
   0x1   :  { %9 = vsyncpa [#allocation4], 0  ;;  %s391_s12 = smov [#allocation2]  }
   0x2   :  { %s17_s13 = sshll.u32 %s391_s12, 4  ;;  %s18_s13 = int_to_ptr.vmem [resolvable:$true] %s17_s13 }
   0x3   :  { %s355_s14 = scalar_lea.vmem %s18_s13, 2048  ;;  %p360_p1 = scmp.lt.s32.totalorder %s18_s13, %s18_s13 }
   0x4   :  { %p356_p0 = scmp.ne.s32.totalorder %s18_s13, %s355_s14  ;;  %p361_p2 = scmp.lt.s32.totalorder %s355_s14, %s355_s14 }
   0x6   :  { %p362_p3 = por %p361_p2, %p360_p1 }
   0x8   :  { %p363_p4 = pnand %p362_p3, %p356_p0 }
   0xa   :  { %366 = shalt.err (!%p363_p4)
}
   0xb   :  { %s392_s15 = smov 128   ;;  %s393_s16 = smov 8  }
   0xc   :  { %23 = dma.hbm_to_vmem [thread:$0]  %s474_s1, 2048, %s18_s13, [#allocation3], %s392_s15, %s392_s15, %s393_s16  }
   0xd   :  { %387 = dma.done.wait [#allocation3], 2048  }
   0xe   :  { %388 = vsyncadd [#allocation3], 4294965248  ;;  %v394_v0 = vmov 0   ;;  %v314_v1 = vld [vmem:[#allocation2 + $0x74] ss:$8 sps:$4 sm:$0xff]   ;;  %v248_v9 = vld [vmem:[%s475_s2] sm:$0xff]  ;;  %v241_v35 = vlaneseq }
   0xf   :  { %166 = vmatprep.mubr.bf16.mxu0 %v394_v0  ;;  %313 = vset.pattern.permute.xlu0 %v394_v0  ;;  %v316_v2 = vld [vmem:[#allocation2 + $0x70] ss:$8 sps:$4 sm:$0xff]   ;;  %v317_v3 = vld [vmem:[#allocation2 + $0x64] ss:$8 sps:$4 sm:$0xff]   ;;  %v319_v4 = vld [vmem:[#allocation2 + $0x60] ss:$8 sps:$4 sm:$0xff]  }
  0x10   :  { %134 = vmatprep.subr.bf16.mxu0 %v314_v1  ;;  %v320_v5 = vld [vmem:[#allocation2 + $0x54] ss:$8 sps:$4 sm:$0xff]   ;;  %v322_v6 = vld [vmem:[#allocation2 + $0x50] ss:$8 sps:$4 sm:$0xff]   ;;  %v323_v7 = vld [vmem:[#allocation2 + $0x44] ss:$8 sps:$4 sm:$0xff]   ;;  %251 = vperm.xlu0 %313, %v248_v9  }
  0x11   :  { %135 = vmatpush1.bf16.msra.mxu0 %v316_v2  ;;  %v325_v8 = vld [vmem:[#allocation2 + $0x40] ss:$8 sps:$4 sm:$0xff]   ;;  %v326_v10 = vld [vmem:[#allocation2 + $0x34] ss:$8 sps:$4 sm:$0xff]   ;;  %v328_v12 = vld [vmem:[#allocation2 + $0x30] ss:$8 sps:$4 sm:$0xff]  }
  0x12   :  { %136 = vmatprep.subr.bf16.mxu0 %v317_v3  ;;  %v249_v11 = vld [vmem:[%s475_s2 + $0x8] sm:$0xff]  ;;  %v332_v15 = vld [vmem:[#allocation2 + $0x14] ss:$8 sps:$4 sm:$0xff]   ;;  %v334_v16 = vld [vmem:[#allocation2 + $0x10] ss:$8 sps:$4 sm:$0xff]   ;;  %v442_v37 = vand.u32 127, %v241_v35 }
  0x13   :  { %v329_v13 = vld [vmem:[#allocation2 + $0x24] ss:$8 sps:$4 sm:$0xff]   ;;  %v331_v14 = vld [vmem:[#allocation2 + $0x20] ss:$8 sps:$4 sm:$0xff]  }
  0x14   :  { %254 = vperm.xlu0 %313, %v249_v11   ;;  %v335_v17 = vld [vmem:[#allocation2 + $0x4] ss:$8 sps:$4 sm:$0xff]   ;;  %v337_v18 = vld [vmem:[#allocation2] ss:$8 sps:$4 sm:$0xff]   ;;  %v445_v38 = vadd.s32 128, %v442_v37 }
  0x15   :  { %137 = vmatpush1.bf16.msra.mxu0 %v319_v4  ;;  %v338_v19 = vld [vmem:[%s473_s0] sm:$0xff]   ;;  %s395_s0 = smov [#allocation5]  }
  0x16   :  { %138 = vmatprep.subr.bf16.mxu0 %v320_v5  ;;  %s273_s2 = sshll.u32 %s395_s0, 4  ;;  %s274_s2 = int_to_ptr.vmem [resolvable:$true] %s273_s2 }
  0x17   :  { %s367_s24 = scalar_lea.vmem %s274_s2, 512  ;;  %p372_p6 = scmp.lt.s32.totalorder %s274_s2, %s274_s2 }
  0x18   :  { %p368_p5 = scmp.ne.s32.totalorder %s274_s2, %s367_s24  ;;  %p373_p7 = scmp.lt.s32.totalorder %s367_s24, %s367_s24 }
  0x19   :  { %139 = vmatpush1.bf16.msra.mxu0 %v322_v6 }
  0x1a   :  { %140 = vmatprep.subr.bf16.mxu0 %v323_v7  ;;  %p374_p8 = por %p373_p7, %p372_p6 }
  0x1c   :  { %p375_p9 = pnand %p374_p8, %p368_p5 }
  0x1d   :  { %141 = vmatpush1.bf16.msra.mxu0 %v325_v8 }
  0x1e   :  { %142 = vmatprep.subr.bf16.mxu0 %v326_v10 }
  0x21   :  { %143 = vmatpush1.bf16.msra.mxu0 %v328_v12 }
  0x22   :  { %144 = vmatprep.subr.bf16.mxu0 %v329_v13 }
  0x25   :  { %145 = vmatpush1.bf16.msra.mxu0 %v331_v14 }
  0x26   :  { %146 = vmatprep.subr.bf16.mxu0 %v332_v15 }
  0x29   :  { %147 = vmatpush1.bf16.msra.mxu0 %v334_v16 }
  0x2a   :  { %148 = vmatprep.subr.bf16.mxu0 %v335_v17 }
  0x2d   :  { %149 = vmatpush1.bf16.msra.mxu0 %v337_v18 }
  0x30   :  { %167 = vmatmul.mubr.bf16.vlgmr.msra.gmra.mxu0 %v338_v19 }
  0x8b   :  { %v252_v42 = vpop.permute.xlu0 %251 }
  0x8c   :  { %vm256_vm2 = vcmp.eq.s32.totalorder %v442_v37, %v252_v42  ;;  %vm257_vm3 = vcmp.eq.s32.totalorder %v445_v38, %v252_v42 }
  0x8f   :  { %v255_v10 = vpop.permute.xlu0 %254 }
  0x90   :  { %vm258_vm13 = vcmp.eq.s32.totalorder %v442_v37, %v255_v10  ;;  %vm259_vm15 = vcmp.eq.s32.totalorder %v445_v38, %v255_v10 }
  0xf0   :  { %v168_v20 = vpop.f32.mrf.mxu0 }
  0xf1   :  { %v177_v21 = vmul.f32 %v168_v20, %v168_v20  ;;  %v217_v46 = vmul.f32 0.87758255, %v168_v20  ;;  %v302_v47 = vadd.f32 -7.670809, %v168_v20  ;;  %vm229_vm5 = vcmp.gt.f32.partialorder %v168_v20, -28.082642 }
  0xf2   :  { %v430_v22 = vpop.f32.mrf.mxu0 }
  0xf3   :  { %v181_v23 = vsub.f32 1024.0, %v177_v21  ;;  %v178_v24 = vmul.f32 %v430_v22, %v430_v22  ;;  %v218_v53 = vmul.f32 0.87758255, %v430_v22  ;;  %v303_v54 = vadd.f32 -7.670809, %v430_v22 }
  0xf4   :  { %v434_v25 = vpop.f32.mrf.mxu0  ;;  %vm230_vm7 = vcmp.gt.f32.partialorder %v430_v22, -28.082642 }
  0xf5   :  { %v185_v26 = vmax.f32 %v181_v23, 0.0  ;;  %v182_v27 = vsub.f32 1024.0, %v178_v24  ;;  %v179_v28 = vmul.f32 %v434_v25, %v434_v25  ;;  %v219_v4 = vmul.f32 0.87758255, %v434_v25 }
  0xf6   :  { %v438_v29 = vpop.f32.mrf.mxu0  ;;  %v304_v7 = vadd.f32 -7.670809, %v434_v25  ;;  %vm231_vm12 = vcmp.gt.f32.partialorder %v434_v25, -28.082642 }
  0xf7   :  { %339 = vrsqrt.f32 %v185_v26  ;;  %v186_v30 = vmax.f32 %v182_v27, 0.0  ;;  %v183_v31 = vsub.f32 1024.0, %v179_v28  ;;  %v180_v32 = vmul.f32 %v438_v29, %v438_v29 }
  0xf8   :  { %vm191_vm0 = vcmp.eq.f32.partialorder %v185_v26, inf  ;;  %v194_v41 = vand.u32 2147483648, %v185_v26  ;;  %vm193_vm1 = vcmp.eq.f32.partialorder %v185_v26, 0.0  ;;  %v220_v11 = vmul.f32 0.87758255, %v438_v29 }
  0xf9   :  { %341 = vrsqrt.f32 %v186_v30  ;;  %v187_v33 = vmax.f32 %v183_v31, 0.0  ;;  %v184_v34 = vsub.f32 1024.0, %v180_v32  ;;  %vm198_vm4 = vcmp.eq.f32.partialorder %v186_v30, inf }
  0xfa   :  { %v201_v50 = vand.u32 2147483648, %v186_v30  ;;  %vm200_vm6 = vcmp.eq.f32.partialorder %v186_v30, 0.0  ;;  %v305_v16 = vadd.f32 -7.670809, %v438_v29  ;;  %vm232_vm14 = vcmp.gt.f32.partialorder %v438_v29, -28.082642 }
  0xfb   :  { %343 = vrsqrt.f32 %v187_v33  ;;  %v188_v36 = vmax.f32 %v184_v34, 0.0  ;;  %vm205_vm8 = vcmp.eq.f32.partialorder %v187_v33, inf  ;;  %vm207_vm9 = vcmp.eq.f32.partialorder %v187_v33, 0.0 }
  0xfc   :  { %v208_v60 = vand.u32 2147483648, %v187_v33 }
  0xfd   :  { %345 = vrsqrt.f32 %v188_v36  ;;  %vm212_vm10 = vcmp.eq.f32.partialorder %v188_v36, inf  ;;  %v215_v1 = vand.u32 2147483648, %v188_v36  ;;  %vm214_vm11 = vcmp.eq.f32.partialorder %v188_v36, 0.0 }
 0x104   :  { %v340_v39 = vpop.eup %339 }
 0x105   :  { %v190_v40 = vmul.f32 %v340_v39, %v185_v26 }
 0x106   :  { %v342_v43 = vpop.eup %341 }
 0x107   :  { %v192_v44 = vsel %vm191_vm0, %v185_v26, %v190_v40  ;;  %v197_v48 = vmul.f32 %v342_v43, %v186_v30 }
 0x108   :  { %v195_v45 = vsel %vm193_vm1, %v194_v41, %v192_v44  ;;  %v344_v51 = vpop.eup %343 }
 0x109   :  { %v221_v49 = vmul.f32 0.47942555, %v195_v45  ;;  %v199_v52 = vsel %vm198_vm4, %v186_v30, %v197_v48  ;;  %v204_v57 = vmul.f32 %v344_v51, %v187_v33 }
 0x10a   :  { %v202_v56 = vsel %vm200_vm6, %v201_v50, %v199_v52  ;;  %v346_v58 = vpop.eup %345 }
 0x10b   :  { %v225_v55 = vsub.f32 %v217_v46, %v221_v49  ;;  %v222_v59 = vmul.f32 0.47942555, %v202_v56  ;;  %v211_v61 = vmul.f32 %v346_v58, %v188_v36  ;;  %v206_v63 = vsel %vm205_vm8, %v187_v33, %v204_v57 }
 0x10c   :  { %v209_v3 = vsel %vm207_vm9, %v208_v60, %v206_v63 }
 0x10d   :  { %v237_v62 = vsel %vm229_vm5, %v225_v55, %v302_v47  ;;  %v226_v0 = vsub.f32 %v218_v53, %v222_v59  ;;  %v213_v5 = vsel %vm212_vm10, %v188_v36, %v211_v61  ;;  %v223_v6 = vmul.f32 0.47942555, %v209_v3 }
 0x10e   :  { %v260_v2 = vsel %vm256_vm2, %v237_v62, %v168_v20  ;;  %v216_v8 = vsel %vm214_vm11, %v215_v1, %v213_v5 }
 0x10f   :  { %264 = vst [vmem:[#allocation5] sm:$0xff] %v260_v2  ;;  %v238_v9 = vsel %vm230_vm7, %v226_v0, %v303_v54  ;;  %v224_v12 = vmul.f32 0.47942555, %v216_v8  ;;  %v227_v14 = vsub.f32 %v219_v4, %v223_v6 }
 0x110   :  { %v261_v13 = vsel %vm257_vm3, %v238_v9, %v430_v22 }
 0x111   :  { %265 = vst [vmem:[#allocation5 + $0x8] sm:$0xff] %v261_v13  ;;  %v228_v15 = vsub.f32 %v220_v11, %v224_v12  ;;  %v239_v17 = vsel %vm231_vm12, %v227_v14, %v304_v7 }
 0x112   :  { %v262_v18 = vsel %vm258_vm13, %v239_v17, %v434_v25 }
 0x113   :  { %v240_v19 = vsel %vm232_vm14, %v228_v15, %v305_v16  ;;  %266 = vst [vmem:[#allocation5 + $0x10] sm:$0xff] %v262_v18 }
 0x114   :  { %v263_v20 = vsel %vm259_vm15, %v240_v19, %v438_v29 }
 0x115   :  { %267 = vst [vmem:[#allocation5 + $0x18] sm:$0xff] %v263_v20 }
 0x116   :  { %378 = shalt.err (!%p375_p9)
}
 0x117   :  { %s396_s25 = smov 256   ;;  %s397_s26 = smov 16  }
 0x118   :  { %279 = dma.vmem_to_hbm [thread:$0]  %s274_s2, 512, %s476_s3, [#allocation4], %s396_s25, %s396_s25, %s397_s26  }
 0x119   :  { %389 = dma.done.wait [#allocation4], 512  }
 0x11a   :  { %390 = vsyncadd [#allocation4], 4294966784 }
 0x11b   :  { %283 = vsyncpa [#allocation3], 1 }
 0x11c   :  { %284 = vsyncpa [#allocation4], 1 }

</bundles_post_ra>
